<compile_context>
chip_gen: v6e
topology: v6e:2x2x1
jax: 0.10.0
libtpu: 0.0.40
codegen_flags: <defaults>
</compile_context>

<pallas_src>
import functools

import jax
import jax.numpy as jnp
from jax.experimental import pallas as pl
from jax.experimental.pallas import tpu as pltpu


# ----------------------------------------------------------------------------
# Pallas kernel: stacked complex 2-layer MLP + ReLU + softshrink (hot path)
# ----------------------------------------------------------------------------
def _lno_mlp_kernel(x_ref, w1_ref, b1_ref, w2_ref, b2_ref, o_ref, *,
                    lam, act_dtype):
    x = x_ref[...]                                           # (tile_n, 2C) bf16
    # layer 1: one MXU matmul covers (real, imag) x (all heads) via the
    # stacked block-diagonal weight; accumulate in f32.
    h = jnp.dot(x, w1_ref[...], preferred_element_type=jnp.float32)
    h = jnp.maximum(h + b1_ref[...], 0.0)                    # (tile_n, 2Cf) f32
    # layer 2
    y = jnp.dot(h.astype(act_dtype), w2_ref[...],
                preferred_element_type=jnp.float32)
    y = y + b2_ref[...]                                      # (tile_n, 2C) f32
    # softshrink(y) = y - clip(y, -lam, lam); lane-dense f32 store.
    o_ref[...] = y - jnp.clip(y, -lam, lam)


def _choose_tiling(n, *, max_tile=2048, multiple=16, min_tiles=2):
    """Pick tile_n so that (a) no padding is needed when possible, (b) tiles
    are as large as possible (amortize the ~600-cycle per-grid-step overhead),
    and (c) at least `min_tiles` grid steps remain so both v7x TensorCores get
    work.  `multiple=16` keeps bf16 sublane tiling happy."""
    if n % multiple == 0:
        best = None
        limit = min(n, max_tile)
        for t in range(multiple, limit + 1, multiple):
            if n % t == 0 and n // t >= min_tiles:
                best = t
        if best is None and n <= max_tile:
            best = n                       # single tile, still no padding
        if best is not None:
            return best, n
    # Fallback: pad to a multiple of a fixed tile.
    # TODO(synk): a masked in-kernel write would avoid this extra HBM pass.
    tile = min(max_tile, 512)
    return tile, pl.cdiv(n, tile) * tile


def _lno_mlp_pallas(x_stk, w1_stk, b1_stk, w2_stk, b2_stk, *, lam,
                    act_dtype=jnp.bfloat16):
    """x_stk: (N, 2C) f32 = [real | imag] channels.  Returns softshrunk
    (N, 2C) f32 output of the stacked complex MLP."""
    n, c2 = x_stk.shape
    cf2 = w1_stk.shape[1]

    tile_n, n_pad = _choose_tiling(n)
    padded = n_pad != n
    if padded:
        x_stk = jnp.pad(x_stk, ((0, n_pad - n), (0, 0)))

    x_in = x_stk.astype(act_dtype)         # halve activation DMA bytes (bf16)

    row_spec = pl.BlockSpec((tile_n, c2), lambda t: (t, 0))
    kernel = functools.partial(_lno_mlp_kernel, lam=lam, act_dtype=act_dtype)

    out = pl.pallas_call(
        kernel,
        out_shape=jax.ShapeDtypeStruct((n_pad, c2), jnp.float32),
        grid_spec=pltpu.PrefetchScalarGridSpec(
            num_scalar_prefetch=0,
            grid=(n_pad // tile_n,),
            in_specs=[
                row_spec,                                         # activations
                pl.BlockSpec((c2, cf2), lambda t: (0, 0)),        # W1 (const)
                pl.BlockSpec((1, cf2), lambda t: (0, 0)),         # b1 (const)
                pl.BlockSpec((cf2, c2), lambda t: (0, 0)),        # W2 (const)
                pl.BlockSpec((1, c2), lambda t: (0, 0)),          # b2 (const)
            ],
            out_specs=row_spec,
        ),
        # Single row-tile axis, fully parallel (v7x megacore gets both steps).
        # VMEM footprint per step is tiny (a few tens of KB), so the default
        # scoped VMEM limit is fine on v5e/v6e/v7x alike.
        compiler_params=pltpu.CompilerParams(
            dimension_semantics=("parallel",)),
    )(x_in, w1_stk, b1_stk, w2_stk, b2_stk)

    if padded:
        out = out[:n]
    return out


# ----------------------------------------------------------------------------
# Weight restructuring (done once per call in the wrapper, outside the kernel)
# ----------------------------------------------------------------------------
def _build_stacked_weights(params, act_dtype=jnp.bfloat16):
    w1, b1, w2, b2 = params["w1"], params["b1"], params["w2"], params["b2"]

    def block_diag(w):                     # (nh, i, o) -> (nh*i, nh*o)
        nh, i, o = w.shape
        eye = jnp.eye(nh, dtype=w.dtype)
        return (eye[:, None, :, None] * w[:, :, None, :]).reshape(nh * i, nh * o)

    def stack_complex(wr, wi):
        # [xr | xi] @ [[wr, wi], [-wi, wr]] = [xr@wr - xi@wi | xr@wi + xi@wr]
        top = jnp.concatenate([wr, wi], axis=1)
        bot = jnp.concatenate([-wi, wr], axis=1)
        return jnp.concatenate([top, bot], axis=0)

    w1_stk = stack_complex(block_diag(w1[0]), block_diag(w1[1])).astype(act_dtype)
    w2_stk = stack_complex(block_diag(w2[0]), block_diag(w2[1])).astype(act_dtype)
    b1_stk = jnp.concatenate([b1[0].reshape(-1), b1[1].reshape(-1)])[None, :]
    b2_stk = jnp.concatenate([b2[0].reshape(-1), b2[1].reshape(-1)])[None, :]
    return (w1_stk, b1_stk.astype(jnp.float32),
            w2_stk, b2_stk.astype(jnp.float32))


# ----------------------------------------------------------------------------
# LNO2D forward (glue in plain JAX, hot path in Pallas)
# ----------------------------------------------------------------------------
def lno2d_init(key, hidden_size, num_heads=8, hidden_size_factor=1, scale=0.02):
    bs = hidden_size // num_heads
    bsf = bs * hidden_size_factor
    k1, k2, k3, k4 = jax.random.split(key, 4)
    return dict(
        w1=scale * jax.random.normal(k1, (2, num_heads, bs, bsf), jnp.float32),
        b1=scale * jax.random.normal(k2, (2, num_heads, bsf), jnp.float32),
        w2=scale * jax.random.normal(k3, (2, num_heads, bsf, bs), jnp.float32),
        b2=scale * jax.random.normal(k4, (2, num_heads, bs), jnp.float32),
    )


def lno2d_forward(x, params, *, num_heads=8, sparsity_threshold=0.01,
                  hard_thresholding_fraction=1.0):
    bias = x
    in_dtype = x.dtype
    B, H, W, C = x.shape
    Wf = W // 2 + 1

    xf = x.astype(jnp.float32)
    # spectral transform (substitute for the undefined laplace_transform)
    Xc = jnp.fft.rfft2(xf, axes=(1, 2))                  # (B, H, Wf, C) complex
    N = B * H * Wf

    # natural row-major layout, real/imag stacked along channels: (N, 2C).
    x_stk = jnp.concatenate([jnp.real(Xc), jnp.imag(Xc)], axis=-1)
    x_stk = x_stk.reshape(N, 2 * C)

    w1_stk, b1_stk, w2_stk, b2_stk = _build_stacked_weights(params)

    o_stk = _lno_mlp_pallas(x_stk, w1_stk, b1_stk, w2_stk, b2_stk,
                            lam=float(sparsity_threshold))
    o_stk = o_stk.reshape(B, H, Wf, 2 * C)
    o2r, o2i = o_stk[..., :C], o_stk[..., C:]

    # hard-thresholding: the torch code leaves zeros outside the kept modes.
    # Skip the masking pass entirely when the kept region is everything.
    total_modes = H // 2 + 1
    kept = int(total_modes * hard_thresholding_fraction)
    full_rows = (total_modes - kept <= 0) and (total_modes + kept >= H)
    full_cols = kept >= Wf
    if not (full_rows and full_cols):
        # TODO(synk): for fraction < 1 the kernel could also restrict N to the
        # kept modes instead of computing everything and zeroing here.
        rows = jnp.arange(H)
        cols = jnp.arange(Wf)
        row_mask = (rows >= total_modes - kept) & (rows < total_modes + kept)
        col_mask = cols < kept
        mask = (row_mask[:, None] & col_mask[None, :])[None, :, :, None]
        o2r = jnp.where(mask, o2r, 0.0)
        o2i = jnp.where(mask, o2i, 0.0)

    out = jnp.fft.irfft2(o2r + 1j * o2i, s=(H, W), axes=(1, 2))   # (B,H,W,C)
    return out.astype(in_dtype) + bias


# ----------------------------------------------------------------------------
# Pure-JAX f32 reference (mirrors the torch math) for a correctness check
# ----------------------------------------------------------------------------
def _softshrink_ref(v, lam):
    return jnp.sign(v) * jnp.maximum(jnp.abs(v) - lam, 0.0)


def lno2d_reference(x, params, *, num_heads=8, sparsity_threshold=0.01,
                    hard_thresholding_fraction=1.0):
    bias = x
    B, H, W, C = x.shape
    nh = num_heads
    bs = C // nh
    Wf = W // 2 + 1
    xf = x.astype(jnp.float32)
    Xc = jnp.fft.rfft2(xf, axes=(1, 2)).reshape(B, H, Wf, nh, bs)
    xr, xi = jnp.real(Xc), jnp.imag(Xc)
    w1, b1, w2, b2 = params["w1"], params["b1"], params["w2"], params["b2"]
    ein = functools.partial(jnp.einsum, "bhwni,nio->bhwno")
    o1r = jax.nn.relu(ein(xr, w1[0]) - ein(xi, w1[1]) + b1[0])
    o1i = jax.nn.relu(ein(xi, w1[0]) + ein(xr, w1[1]) + b1[1])
    o2r = ein(o1r, w2[0]) - ein(o1i, w2[1]) + b2[0]
    o2i = ein(o1i, w2[0]) + ein(o1r, w2[1]) + b2[1]
    lam = sparsity_threshold
    o2r = _softshrink_ref(o2r, lam).reshape(B, H, Wf, C)
    o2i = _softshrink_ref(o2i, lam).reshape(B, H, Wf, C)
    total_modes = H // 2 + 1
    kept = int(total_modes * hard_thresholding_fraction)
    rows, cols = jnp.arange(H), jnp.arange(Wf)
    mask = (((rows >= total_modes - kept) & (rows < total_modes + kept))[:, None]
            & (cols < kept)[None, :])[None, :, :, None]
    Xout = jnp.where(mask, o2r, 0.0) + 1j * jnp.where(mask, o2i, 0.0)
    out = jnp.fft.irfft2(Xout, s=(H, W), axes=(1, 2))
    return out.astype(x.dtype) + bias


# ----------------------------------------------------------------------------
if __name__ == "__main__":
    B, H, W, C = 2, 16, 16, 32
    num_heads = 8

    key = jax.random.PRNGKey(0)
    k_x, k_p = jax.random.split(key)
    x = jax.random.normal(k_x, (B, H, W, C), jnp.float32)
    params = lno2d_init(k_p, hidden_size=C, num_heads=num_heads)

    out = jax.block_until_ready(lno2d_forward(x, params, num_heads=num_heads))
    ref = jax.block_until_ready(lno2d_reference(x, params, num_heads=num_heads))

    assert out.shape == (B, H, W, C)
    max_err = float(jnp.max(jnp.abs(out - ref)))
    assert jnp.allclose(out, ref, atol=2e-3, rtol=2e-3), max_err

    print("KERNEL_OK")
</pallas_src>

<mosaic_0001>
module attributes {stable_mosaic.version = 11 : i64} {
  func.func @_lno_mlp_kernel(%arg0: i32, %arg1: memref<144x64xbf16, #tpu.memory_space<vmem>>, %arg2: memref<64x64xbf16, #tpu.memory_space<vmem>>, %arg3: memref<1x64xf32, #tpu.memory_space<vmem>>, %arg4: memref<64x64xbf16, #tpu.memory_space<vmem>>, %arg5: memref<1x64xf32, #tpu.memory_space<vmem>>, %arg6: memref<144x64xf32, #tpu.memory_space<vmem>>) attributes {dimension_semantics = [#tpu.dimension_semantics<parallel>], iteration_bounds = array<i64: 2>, scalar_prefetch = 0 : i64, scratch_operands = 0 : i64, tpu.core_type = #tpu.core_type<tc>, window_params = [{transform_indices = @transform_0, window_bounds = array<i64: 144, 64>}, {pipeline_mode = #tpu.pipeline_mode<synchronous>, transform_indices = @transform_1, window_bounds = array<i64: 64, 64>}, {pipeline_mode = #tpu.pipeline_mode<synchronous>, transform_indices = @transform_2, window_bounds = array<i64: 1, 64>}, {pipeline_mode = #tpu.pipeline_mode<synchronous>, transform_indices = @transform_3, window_bounds = array<i64: 64, 64>}, {pipeline_mode = #tpu.pipeline_mode<synchronous>, transform_indices = @transform_4, window_bounds = array<i64: 1, 64>}, {transform_indices = @transform_5, window_bounds = array<i64: 144, 64>}]} {
    %c0 = arith.constant 0 : index
    %c0_0 = arith.constant 0 : index
    %0 = vector.load %arg1[%c0, %c0_0] : memref<144x64xbf16, #tpu.memory_space<vmem>>, vector<144x64xbf16>
    %c0_1 = arith.constant 0 : index
    %c0_2 = arith.constant 0 : index
    %1 = vector.load %arg2[%c0_1, %c0_2] : memref<64x64xbf16, #tpu.memory_space<vmem>>, vector<64x64xbf16>
    %cst = arith.constant dense<0.000000e+00> : vector<144x64xf32>
    %2 = tpu.matmul %0, %1, %cst {dimension_numbers = #tpu.dot_dimension_numbers<[1], [0], [0], [1], [0, 0, 1, 1], [], []>} : vector<144x64xbf16>, vector<64x64xbf16>, vector<144x64xf32> -> vector<144x64xf32>
    %c0_3 = arith.constant 0 : index
    %c0_4 = arith.constant 0 : index
    %3 = vector.load %arg3[%c0_3, %c0_4] : memref<1x64xf32, #tpu.memory_space<vmem>>, vector<1x64xf32>
    %4 = vector.broadcast %3 : vector<1x64xf32> to vector<144x64xf32>
    %5 = arith.addf %2, %4 : vector<144x64xf32>
    %cst_5 = arith.constant 0.000000e+00 : f32
    %6 = vector.broadcast %cst_5 : f32 to vector<144x64xf32>
    %7 = arith.maximumf %5, %6 : vector<144x64xf32>
    %8 = arith.truncf %7 : vector<144x64xf32> to vector<144x64xbf16>
    %c0_6 = arith.constant 0 : index
    %c0_7 = arith.constant 0 : index
    %9 = vector.load %arg4[%c0_6, %c0_7] : memref<64x64xbf16, #tpu.memory_space<vmem>>, vector<64x64xbf16>
    %cst_8 = arith.constant dense<0.000000e+00> : vector<144x64xf32>
    %10 = tpu.matmul %8, %9, %cst_8 {dimension_numbers = #tpu.dot_dimension_numbers<[1], [0], [0], [1], [0, 0, 1, 1], [], []>} : vector<144x64xbf16>, vector<64x64xbf16>, vector<144x64xf32> -> vector<144x64xf32>
    %c0_9 = arith.constant 0 : index
    %c0_10 = arith.constant 0 : index
    %11 = vector.load %arg5[%c0_9, %c0_10] : memref<1x64xf32, #tpu.memory_space<vmem>>, vector<1x64xf32>
    %12 = vector.broadcast %11 : vector<1x64xf32> to vector<144x64xf32>
    %13 = arith.addf %10, %12 : vector<144x64xf32>
    %cst_11 = arith.constant -0.00999999977 : f32
    %cst_12 = arith.constant 0.00999999977 : f32
    %14 = vector.broadcast %cst_11 : f32 to vector<144x64xf32>
    %15 = arith.maximumf %14, %13 : vector<144x64xf32>
    %16 = vector.broadcast %cst_12 : f32 to vector<144x64xf32>
    %17 = arith.minimumf %16, %15 : vector<144x64xf32>
    %18 = arith.subf %13, %17 : vector<144x64xf32>
    %c0_13 = arith.constant 0 : index
    %c0_14 = arith.constant 0 : index
    %19 = vector.load %arg6[%c0_13, %c0_14] : memref<144x64xf32, #tpu.memory_space<vmem>>, vector<144x64xf32>
    tpu.vector_store %arg6[%c0_13, %c0_14], %18 {strides = array<i32>} : memref<144x64xf32, #tpu.memory_space<vmem>>, vector<144x64xf32>,
    return
  }
  func.func @transform_0(%arg0: i32) -> (i32, i32) {
    %c0_i32 = arith.constant 0 : i32
    %c0_i32_0 = arith.constant 0 : i32
    return %arg0, %c0_i32 : i32, i32
  }
  func.func @transform_1(%arg0: i32) -> (i32, i32) {
    %c0_i32 = arith.constant 0 : i32
    %c0_i32_0 = arith.constant 0 : i32
    %c0_i32_1 = arith.constant 0 : i32
    return %c0_i32, %c0_i32_0 : i32, i32
  }
  func.func @transform_2(%arg0: i32) -> (i32, i32) {
    %c0_i32 = arith.constant 0 : i32
    %c0_i32_0 = arith.constant 0 : i32
    %c0_i32_1 = arith.constant 0 : i32
    return %c0_i32, %c0_i32_0 : i32, i32
  }
  func.func @transform_3(%arg0: i32) -> (i32, i32) {
    %c0_i32 = arith.constant 0 : i32
    %c0_i32_0 = arith.constant 0 : i32
    %c0_i32_1 = arith.constant 0 : i32
    return %c0_i32, %c0_i32_0 : i32, i32
  }
  func.func @transform_4(%arg0: i32) -> (i32, i32) {
    %c0_i32 = arith.constant 0 : i32
    %c0_i32_0 = arith.constant 0 : i32
    %c0_i32_1 = arith.constant 0 : i32
    return %c0_i32, %c0_i32_0 : i32, i32
  }
  func.func @transform_5(%arg0: i32) -> (i32, i32) {
    %c0_i32 = arith.constant 0 : i32
    %c0_i32_0 = arith.constant 0 : i32
    return %arg0, %c0_i32 : i32, i32
  }
}

</mosaic_0001>

<bundles_post_ra>
// kernel: tpu_custom_call.1
= control target key start
LH: loop header
LB: loop body
LE: loop exit
PB: predicated region body
PF: predicated region fallthrough
CT: control target
= control target key end

     0   :  { %s1035_s18 = smov 0   ;;  %s1226_s0 = inlined_call_operand.vmem [shape: bf16[288,64], index: 0, kind: input, shape index: {}]   ;;  %s1227_s1 = inlined_call_operand.vmem [shape: bf16[64,64], index: 1, kind: input, shape index: {}]   ;;  %s1228_s2 = inlined_call_operand.vmem [shape: f32[1,64], index: 2, kind: input, shape index: {}]   ;;  %s1229_s3 = inlined_call_operand.vmem [shape: bf16[64,64], index: 3, kind: input, shape index: {}]   ;;  %s1230_s4 = inlined_call_operand.vmem [shape: f32[1,64], index: 4, kind: input, shape index: {}]   ;;  %s1231_s5 = inlined_call_operand.vmem [shape: f32[288,64], index: 5, kind: output, shape index: {}]  }
   0x1 LB: > { %s790_s19 = sadd.s32 4294967295, %s1001_s18   ;;  %p794_p0 = scmp.ge.s32.totalorder %s1001_s18, 1  ;;  %s1001_s18 = sphi %s1035_s18, %s15_s18  }
   0x2   : > { %p188_p1 = scmp.lt.s32.totalorder %s1001_s18, 3 }
   0x4   : > { %p189_p2 = pnand %p794_p0, %p188_p1 }
   0x5   : > { %s216_s24 = smul.u32 (!%p189_p2), 18, %s790_s19 }
   0x6   : > { %192 = sbr.rel (%p189_p2) target bundleno = 499 (0x1f3), region = 40 }
   0x7   : > { %p217_p3 = scmp.lt.s32.totalorder (!%p189_p2), %s216_s24, 35 }
   0xb   : > { %v978_v0 = vld [vmem:[%s1227_s1 + $0x18] sm:$0xff]   ;;  %v1003_v1 = vmov 0.0   ;;  %v979_v2 = vld [vmem:[%s1227_s1 + $0x10] sm:$0xff]   ;;  %vm1004_vm0 = vmmov 0   ;;  %v980_v4 = vld [vmem:[%s1227_s1 + $0x8] sm:$0xff]   ;;  %s1233_s24 = smov (!%p217_p3, %s216_s24), 35 }
   0xc   : > { %880 = vmatprep.subr.bf16.mxu0 %v1003_v1  ;;  %924 = vmatprep.subr.bf16.mxu1 %v1003_v1  ;;  %v991_v3 = vld [vmem:[%s1229_s3 + $0x18] sm:$0xff]   ;;  %s795_s29 = sshll.u32 %s1233_s24, 2  ;;  %v981_v5 = vld [vmem:[%s1227_s1] sm:$0xff]   ;;  %vm331_vm1 = vcmask 523264   ;;  %v992_v15 = vld [vmem:[%s1229_s3 + $0x10] sm:$0xff]   ;;  %s796_s21 = sshll.u32 %s1233_s24, 3 }
   0xd   : > { %881 = vmatpush3.bf16.msra.mxu0 %v978_v0  ;;  %888 = vmatprep.mubr.msk.bf16.mxu0 %vm1004_vm0, %v1003_v1  ;;  %s220_s7 = scalar_lea.vmem %s1226_s0, %s795_s29  ;;  %v993_v16 = vld [vmem:[%s1229_s3 + $0x8] sm:$0xff]   ;;  %v994_v17 = vld [vmem:[%s1229_s3] sm:$0xff]   ;;  %s1168_s25 = scalar_lea.vmem %s1231_s5, %s796_s21 }
   0xe   : > { %882 = vmatprep.subr.bf16.mxu0 %v1003_v1  ;;  %932 = vmatprep.mubr.msk.bf16.mxu1 %vm1004_vm0, %v1003_v1  ;;  %v982_v6 = vld [vmem:[%s220_s7] sm:$0xff]   ;;  %v983_v7 = vld [vmem:[%s220_s7 + $0x8] sm:$0xff]   ;;  %v984_v8 = vld [vmem:[%s220_s7 + $0x10] sm:$0xff]  }
   0xf   : > { %925 = vmatpush3.bf16.msra.mxu1 %v991_v3  ;;  %v985_v9 = vld [vmem:[%s220_s7 + $0x18] sm:$0xff]   ;;  %v986_v10 = vld [vmem:[%s220_s7 + $0x20] sm:$0xff]   ;;  %v987_v11 = vld [vmem:[%s220_s7 + $0x28] sm:$0xff]  }
  0x10   : > { %926 = vmatprep.subr.bf16.mxu1 %v1003_v1  ;;  %v988_v12 = vld [vmem:[%s220_s7 + $0x30] sm:$0xff]   ;;  %v989_v13 = vld [vmem:[%s220_s7 + $0x38] sm:$0xff]   ;;  %v990_v14 = vld [vmem:[%s220_s7 + $0x40] sm:$0xff]  }
  0x11   : > { %883 = vmatpush3.bf16.msra.mxu0 %v979_v2  ;;  %v1113_v18 = vld [vmem:[%s1228_s2] ss:$0 sm:$0xff] }
  0x12   : > { %884 = vmatprep.subr.bf16.mxu0 %v1003_v1 }
  0x13   : > { %927 = vmatpush3.bf16.msra.mxu1 %v992_v15 }
  0x14   : > { %928 = vmatprep.subr.bf16.mxu1 %v1003_v1 }
  0x15   : > { %885 = vmatpush3.bf16.msra.mxu0 %v980_v4 }
  0x16   : > { %886 = vmatprep.subr.bf16.mxu0 %v1003_v1 }
  0x17   : > { %929 = vmatpush3.bf16.msra.mxu1 %v993_v16 }
  0x18   : > { %930 = vmatprep.subr.bf16.mxu1 %v1003_v1 }
  0x19   : > { %887 = vmatpush3.bf16.msra.mxu0 %v981_v5 }
  0x1b   : > { %931 = vmatpush3.bf16.msra.mxu1 %v994_v17 }
  0x1c   : > { %889 = vmatmul.mubr.msk.bf16.vlgmr.msra.gmra.mxu0 %vm331_vm1, %v982_v6 }
  0x1d   : > { %892 = vmatprep.mubr.msk.bf16.mxu0 %vm1004_vm0, %v1003_v1 }
  0x24   : > { %893 = vmatmul.mubr.msk.bf16.gmra.mxu0 %vm331_vm1, %v983_v7 }
  0x25   : > { %896 = vmatprep.mubr.msk.bf16.mxu0 %vm1004_vm0, %v1003_v1 }
  0x2c   : > { %897 = vmatmul.mubr.msk.bf16.gmra.mxu0 %vm331_vm1, %v984_v8 }
  0x2d   : > { %900 = vmatprep.mubr.msk.bf16.mxu0 %vm1004_vm0, %v1003_v1 }
  0x34   : > { %901 = vmatmul.mubr.msk.bf16.gmra.mxu0 %vm331_vm1, %v985_v9 }
  0x35   : > { %904 = vmatprep.mubr.msk.bf16.mxu0 %vm1004_vm0, %v1003_v1 }
  0x3c   : > { %905 = vmatmul.mubr.msk.bf16.gmra.mxu0 %vm331_vm1, %v986_v10 }
  0x3d   : > { %908 = vmatprep.mubr.msk.bf16.mxu0 %vm1004_vm0, %v1003_v1 }
  0x44   : > { %909 = vmatmul.mubr.msk.bf16.gmra.mxu0 %vm331_vm1, %v987_v11 }
  0x45   : > { %912 = vmatprep.mubr.msk.bf16.mxu0 %vm1004_vm0, %v1003_v1 }
  0x4c   : > { %913 = vmatmul.mubr.msk.bf16.gmra.mxu0 %vm331_vm1, %v988_v12 }
  0x4d   : > { %916 = vmatprep.mubr.msk.bf16.mxu0 %vm1004_vm0, %v1003_v1 }
  0x54   : > { %917 = vmatmul.mubr.msk.bf16.gmra.mxu0 %vm331_vm1, %v989_v13 }
  0x55   : > { %920 = vmatprep.mubr.msk.bf16.mxu0 %vm1004_vm0, %v1003_v1 }
  0x5c   : > { %921 = vmatmul.mubr.msk.bf16.gmra.mxu0 %vm331_vm1, %v990_v14 }
  0xdc   : > { %v393_v19 = vpop.f32.mrf.mxu0 }
  0xdd   : > { %v394_v21 = vadd.f32 %v1113_v18, %v393_v19 }
  0xde   : > { %v890_v20 = vpop.f32.mrf.mxu0 }
  0xdf   : > { %v464_v25 = vmax.f32 %v394_v21, 0.0 }
  0xe0   : > { %v396_v22 = vpop.f32.mrf.mxu0 }
  0xe1   : > { %v397_v23 = vadd.f32 %v1113_v18, %v396_v22 }
  0xe2   : > { %v891_v24 = vpop.f32.mrf.mxu0 }
  0xe3   : > { %v465_v26 = vmax.f32 %v397_v23, 0.0 }
  0xe4   : > { %v401_v27 = vpop.f32.mrf.mxu0 }
  0xe5   : > { %v482_v28 = vpack.c.bf16 %v465_v26, %v464_v25  ;;  %v402_v30 = vadd.f32 %v1113_v18, %v401_v27 }
  0xe6   : > { %v894_v29 = vpop.f32.mrf.mxu0 }
  0xe7   : > { %933 = vmatmul.mubr.msk.bf16.vlgmr.msra.gmra.mxu1 %vm331_vm1, %v482_v28  ;;  %v466_v34 = vmax.f32 %v402_v30, 0.0 }
  0xe8   : > { %v404_v31 = vpop.f32.mrf.mxu0  ;;  %936 = vmatprep.mubr.msk.bf16.mxu1 %vm1004_vm0, %v1003_v1 }
  0xe9   : > { %v405_v32 = vadd.f32 %v1113_v18, %v404_v31 }
  0xea   : > { %v895_v33 = vpop.f32.mrf.mxu0 }
  0xeb   : > { %v467_v35 = vmax.f32 %v405_v32, 0.0 }
  0xec   : > { %v409_v36 = vpop.f32.mrf.mxu0 }
  0xed   : > { %v483_v37 = vpack.c.bf16 %v467_v35, %v466_v34  ;;  %v410_v39 = vadd.f32 %v1113_v18, %v409_v36 }
  0xee   : > { %v898_v38 = vpop.f32.mrf.mxu0 }
  0xef   : > { %937 = vmatmul.mubr.msk.bf16.gmra.mxu1 %vm331_vm1, %v483_v37  ;;  %v468_v43 = vmax.f32 %v410_v39, 0.0  ;;  %v1161_v38 = vld [vmem:[%s1230_s4] ss:$0 sm:$0xff] }
  0xf0   : > { %v412_v40 = vpop.f32.mrf.mxu0  ;;  %940 = vmatprep.mubr.msk.bf16.mxu1 %vm1004_vm0, %v1003_v1 }
  0xf1   : > { %v413_v41 = vadd.f32 %v1113_v18, %v412_v40 }
  0xf2   : > { %v899_v42 = vpop.f32.mrf.mxu0 }
  0xf3   : > { %v469_v44 = vmax.f32 %v413_v41, 0.0 }
  0xf4   : > { %v417_v45 = vpop.f32.mrf.mxu0 }
  0xf5   : > { %v484_v46 = vpack.c.bf16 %v469_v44, %v468_v43  ;;  %v418_v48 = vadd.f32 %v1113_v18, %v417_v45 }
  0xf6   : > { %v902_v47 = vpop.f32.mrf.mxu0 }
  0xf7   : > { %941 = vmatmul.mubr.msk.bf16.gmra.mxu1 %vm331_vm1, %v484_v46  ;;  %v470_v52 = vmax.f32 %v418_v48, 0.0 }
  0xf8   : > { %v420_v49 = vpop.f32.mrf.mxu0  ;;  %944 = vmatprep.mubr.msk.bf16.mxu1 %vm1004_vm0, %v1003_v1 }
  0xf9   : > { %v421_v50 = vadd.f32 %v1113_v18, %v420_v49 }
  0xfa   : > { %v903_v51 = vpop.f32.mrf.mxu0 }
  0xfb   : > { %v471_v53 = vmax.f32 %v421_v50, 0.0 }
  0xfc   : > { %v425_v54 = vpop.f32.mrf.mxu0 }
  0xfd   : > { %v485_v55 = vpack.c.bf16 %v471_v53, %v470_v52  ;;  %v426_v57 = vadd.f32 %v1113_v18, %v425_v54 }
  0xfe   : > { %v906_v56 = vpop.f32.mrf.mxu0 }
  0xff   : > { %945 = vmatmul.mubr.msk.bf16.gmra.mxu1 %vm331_vm1, %v485_v55  ;;  %v472_v61 = vmax.f32 %v426_v57, 0.0 }
 0x100   : > { %v428_v58 = vpop.f32.mrf.mxu0  ;;  %948 = vmatprep.mubr.msk.bf16.mxu1 %vm1004_vm0, %v1003_v1 }
 0x101   : > { %v429_v59 = vadd.f32 %v1113_v18, %v428_v58 }
 0x102   : > { %v907_v60 = vpop.f32.mrf.mxu0 }
 0x103   : > { %v473_v62 = vmax.f32 %v429_v59, 0.0 }
 0x104   : > { %v433_v63 = vpop.f32.mrf.mxu0 }
 0x105   : > { %v486_v0 = vpack.c.bf16 %v473_v62, %v472_v61  ;;  %v434_v3 = vadd.f32 %v1113_v18, %v433_v63 }
 0x106   : > { %v910_v2 = vpop.f32.mrf.mxu0 }
 0x107   : > { %949 = vmatmul.mubr.msk.bf16.gmra.mxu1 %vm331_vm1, %v486_v0  ;;  %v474_v7 = vmax.f32 %v434_v3, 0.0 }
 0x108   : > { %v436_v4 = vpop.f32.mrf.mxu0  ;;  %952 = vmatprep.mubr.msk.bf16.mxu1 %vm1004_vm0, %v1003_v1 }
 0x109   : > { %v437_v5 = vadd.f32 %v1113_v18, %v436_v4 }
 0x10a   : > { %v911_v6 = vpop.f32.mrf.mxu0 }
 0x10b   : > { %v475_v8 = vmax.f32 %v437_v5, 0.0 }
 0x10c   : > { %v441_v9 = vpop.f32.mrf.mxu0 }
 0x10d   : > { %v487_v10 = vpack.c.bf16 %v475_v8, %v474_v7  ;;  %v442_v12 = vadd.f32 %v1113_v18, %v441_v9 }
 0x10e   : > { %v914_v11 = vpop.f32.mrf.mxu0 }
 0x10f   : > { %953 = vmatmul.mubr.msk.bf16.gmra.mxu1 %vm331_vm1, %v487_v10  ;;  %v476_v16 = vmax.f32 %v442_v12, 0.0 }
 0x110   : > { %v444_v13 = vpop.f32.mrf.mxu0  ;;  %956 = vmatprep.mubr.msk.bf16.mxu1 %vm1004_vm0, %v1003_v1 }
 0x111   : > { %v445_v14 = vadd.f32 %v1113_v18, %v444_v13 }
 0x112   : > { %v915_v15 = vpop.f32.mrf.mxu0 }
 0x113   : > { %v477_v17 = vmax.f32 %v445_v14, 0.0 }
 0x114   : > { %v449_v19 = vpop.f32.mrf.mxu0 }
 0x115   : > { %v488_v20 = vpack.c.bf16 %v477_v17, %v476_v16  ;;  %v450_v22 = vadd.f32 %v1113_v18, %v449_v19 }
 0x116   : > { %v918_v21 = vpop.f32.mrf.mxu0 }
 0x117   : > { %957 = vmatmul.mubr.msk.bf16.gmra.mxu1 %vm331_vm1, %v488_v20  ;;  %v478_v26 = vmax.f32 %v450_v22, 0.0 }
 0x118   : > { %v452_v23 = vpop.f32.mrf.mxu0  ;;  %960 = vmatprep.mubr.msk.bf16.mxu1 %vm1004_vm0, %v1003_v1 }
 0x119   : > { %v453_v24 = vadd.f32 %v1113_v18, %v452_v23 }
 0x11a   : > { %v919_v25 = vpop.f32.mrf.mxu0 }
 0x11b   : > { %v479_v27 = vmax.f32 %v453_v24, 0.0 }
 0x11c   : > { %v457_v28 = vpop.f32.mrf.mxu0 }
 0x11d   : > { %v489_v29 = vpack.c.bf16 %v479_v27, %v478_v26  ;;  %v458_v31 = vadd.f32 %v1113_v18, %v457_v28 }
 0x11e   : > { %v922_v30 = vpop.f32.mrf.mxu0 }
 0x11f   : > { %961 = vmatmul.mubr.msk.bf16.gmra.mxu1 %vm331_vm1, %v489_v29  ;;  %v480_v35 = vmax.f32 %v458_v31, 0.0 }
 0x120   : > { %v460_v32 = vpop.f32.mrf.mxu0  ;;  %964 = vmatprep.mubr.msk.bf16.mxu1 %vm1004_vm0, %v1003_v1 }
 0x121   : > { %v461_v33 = vadd.f32 %v1113_v18, %v460_v32 }
 0x122   : > { %v923_v34 = vpop.f32.mrf.mxu0 }
 0x123   : > { %v481_v36 = vmax.f32 %v461_v33, 0.0 }
 0x125   : > { %v490_v37 = vpack.c.bf16 %v481_v36, %v480_v35 }
 0x127   : > { %965 = vmatmul.mubr.msk.bf16.gmra.mxu1 %vm331_vm1, %v490_v37 }
 0x1a7   : > { %v591_v39 = vpop.f32.mrf.mxu1 }
 0x1a8   : > { %v592_v40 = vadd.f32 %v1161_v38, %v591_v39 }
 0x1a9   : > { %v934_v41 = vpop.f32.mrf.mxu1 }
 0x1aa   : > { %v834_v42 = vclamps-f32 %v592_v40, 0.01 }
 0x1ab   : > { %v594_v1 = vpop.f32.mrf.mxu1 }
 0x1ac   : > { %v698_v18 = vsub.f32 %v592_v40, %v834_v42  ;;  %v595_v43 = vadd.f32 %v1161_v38, %v594_v1 }
 0x1ad   : > { %v935_v44 = vpop.f32.mrf.mxu1 }
 0x1ae   : > { %716 = vst.msk [vmem:[%s1168_s25] sm:$0xff] %vm331_vm1, %v698_v18  ;;  %v835_v45 = vclamps-f32 %v595_v43, 0.01 }
 0x1af   : > { %v599_v46 = vpop.f32.mrf.mxu1 }
 0x1b0   : > { %v699_v47 = vsub.f32 %v595_v43, %v835_v45  ;;  %v600_v48 = vadd.f32 %v1161_v38, %v599_v46 }
 0x1b1   : > { %v938_v49 = vpop.f32.mrf.mxu1 }
 0x1b2   : > { %717 = vst.msk [vmem:[%s1168_s25 + $0x8] sm:$0xff] %vm331_vm1, %v699_v47  ;;  %v836_v50 = vclamps-f32 %v600_v48, 0.01 }
 0x1b3   : > { %v602_v51 = vpop.f32.mrf.mxu1 }
 0x1b4   : > { %v700_v52 = vsub.f32 %v600_v48, %v836_v50  ;;  %v603_v53 = vadd.f32 %v1161_v38, %v602_v51 }
 0x1b5   : > { %v939_v54 = vpop.f32.mrf.mxu1 }
 0x1b6   : > { %718 = vst.msk [vmem:[%s1168_s25 + $0x10] sm:$0xff] %vm331_vm1, %v700_v52  ;;  %v837_v55 = vclamps-f32 %v603_v53, 0.01 }
 0x1b7   : > { %v607_v56 = vpop.f32.mrf.mxu1 }
 0x1b8   : > { %v701_v57 = vsub.f32 %v603_v53, %v837_v55  ;;  %v608_v58 = vadd.f32 %v1161_v38, %v607_v56 }
 0x1b9   : > { %v942_v59 = vpop.f32.mrf.mxu1 }
 0x1ba   : > { %719 = vst.msk [vmem:[%s1168_s25 + $0x18] sm:$0xff] %vm331_vm1, %v701_v57  ;;  %v838_v60 = vclamps-f32 %v608_v58, 0.01 }
 0x1bb   : > { %v610_v61 = vpop.f32.mrf.mxu1 }
 0x1bc   : > { %v702_v62 = vsub.f32 %v608_v58, %v838_v60  ;;  %v611_v63 = vadd.f32 %v1161_v38, %v610_v61 }
 0x1bd   : > { %v943_v0 = vpop.f32.mrf.mxu1 }
 0x1be   : > { %720 = vst.msk [vmem:[%s1168_s25 + $0x20] sm:$0xff] %vm331_vm1, %v702_v62  ;;  %v839_v2 = vclamps-f32 %v611_v63, 0.01 }
 0x1bf   : > { %v615_v3 = vpop.f32.mrf.mxu1 }
 0x1c0   : > { %v703_v4 = vsub.f32 %v611_v63, %v839_v2  ;;  %v616_v5 = vadd.f32 %v1161_v38, %v615_v3 }
 0x1c1   : > { %v946_v6 = vpop.f32.mrf.mxu1 }
 0x1c2   : > { %721 = vst.msk [vmem:[%s1168_s25 + $0x28] sm:$0xff] %vm331_vm1, %v703_v4  ;;  %v840_v7 = vclamps-f32 %v616_v5, 0.01 }
 0x1c3   : > { %v618_v8 = vpop.f32.mrf.mxu1 }
 0x1c4   : > { %v704_v9 = vsub.f32 %v616_v5, %v840_v7  ;;  %v619_v10 = vadd.f32 %v1161_v38, %v618_v8 }
 0x1c5   : > { %v947_v11 = vpop.f32.mrf.mxu1 }
 0x1c6   : > { %722 = vst.msk [vmem:[%s1168_s25 + $0x30] sm:$0xff] %vm331_vm1, %v704_v9  ;;  %v841_v12 = vclamps-f32 %v619_v10, 0.01 }
 0x1c7   : > { %v623_v13 = vpop.f32.mrf.mxu1 }
 0x1c8   : > { %v705_v14 = vsub.f32 %v619_v10, %v841_v12  ;;  %v624_v15 = vadd.f32 %v1161_v38, %v623_v13 }
 0x1c9   : > { %v950_v16 = vpop.f32.mrf.mxu1 }
 0x1ca   : > { %723 = vst.msk [vmem:[%s1168_s25 + $0x38] sm:$0xff] %vm331_vm1, %v705_v14  ;;  %v842_v17 = vclamps-f32 %v624_v15, 0.01 }
 0x1cb   : > { %v626_v19 = vpop.f32.mrf.mxu1 }
 0x1cc   : > { %v706_v20 = vsub.f32 %v624_v15, %v842_v17  ;;  %v627_v21 = vadd.f32 %v1161_v38, %v626_v19 }
 0x1cd   : > { %v951_v22 = vpop.f32.mrf.mxu1 }
 0x1ce   : > { %724 = vst.msk [vmem:[%s1168_s25 + $0x40] sm:$0xff] %vm331_vm1, %v706_v20  ;;  %v843_v23 = vclamps-f32 %v627_v21, 0.01 }
 0x1cf   : > { %v631_v24 = vpop.f32.mrf.mxu1 }
 0x1d0   : > { %v707_v25 = vsub.f32 %v627_v21, %v843_v23  ;;  %v632_v26 = vadd.f32 %v1161_v38, %v631_v24 }
 0x1d1   : > { %v954_v27 = vpop.f32.mrf.mxu1 }
 0x1d2   : > { %725 = vst.msk [vmem:[%s1168_s25 + $0x48] sm:$0xff] %vm331_vm1, %v707_v25  ;;  %v844_v28 = vclamps-f32 %v632_v26, 0.01 }
 0x1d3   : > { %v634_v29 = vpop.f32.mrf.mxu1 }
 0x1d4   : > { %v708_v30 = vsub.f32 %v632_v26, %v844_v28  ;;  %v635_v31 = vadd.f32 %v1161_v38, %v634_v29 }
 0x1d5   : > { %v955_v32 = vpop.f32.mrf.mxu1 }
 0x1d6   : > { %726 = vst.msk [vmem:[%s1168_s25 + $0x50] sm:$0xff] %vm331_vm1, %v708_v30  ;;  %v845_v33 = vclamps-f32 %v635_v31, 0.01 }
 0x1d7   : > { %v639_v34 = vpop.f32.mrf.mxu1 }
 0x1d8   : > { %v709_v35 = vsub.f32 %v635_v31, %v845_v33  ;;  %v640_v36 = vadd.f32 %v1161_v38, %v639_v34 }
 0x1d9   : > { %v958_v37 = vpop.f32.mrf.mxu1 }
 0x1da   : > { %727 = vst.msk [vmem:[%s1168_s25 + $0x58] sm:$0xff] %vm331_vm1, %v709_v35  ;;  %v846_v39 = vclamps-f32 %v640_v36, 0.01 }
 0x1db   : > { %v642_v40 = vpop.f32.mrf.mxu1 }
 0x1dc   : > { %v710_v41 = vsub.f32 %v640_v36, %v846_v39  ;;  %v643_v42 = vadd.f32 %v1161_v38, %v642_v40 }
 0x1dd   : > { %v959_v1 = vpop.f32.mrf.mxu1 }
 0x1de   : > { %728 = vst.msk [vmem:[%s1168_s25 + $0x60] sm:$0xff] %vm331_vm1, %v710_v41  ;;  %v847_v18 = vclamps-f32 %v643_v42, 0.01 }
 0x1df   : > { %v647_v43 = vpop.f32.mrf.mxu1 }
 0x1e0   : > { %v711_v44 = vsub.f32 %v643_v42, %v847_v18  ;;  %v648_v45 = vadd.f32 %v1161_v38, %v647_v43 }
 0x1e1   : > { %v962_v46 = vpop.f32.mrf.mxu1 }
 0x1e2   : > { %729 = vst.msk [vmem:[%s1168_s25 + $0x68] sm:$0xff] %vm331_vm1, %v711_v44  ;;  %v848_v47 = vclamps-f32 %v648_v45, 0.01 }
 0x1e3   : > { %v650_v48 = vpop.f32.mrf.mxu1 }
 0x1e4   : > { %v712_v49 = vsub.f32 %v648_v45, %v848_v47  ;;  %v651_v50 = vadd.f32 %v1161_v38, %v650_v48 }
 0x1e5   : > { %v963_v51 = vpop.f32.mrf.mxu1 }
 0x1e6   : > { %730 = vst.msk [vmem:[%s1168_s25 + $0x70] sm:$0xff] %vm331_vm1, %v712_v49  ;;  %v849_v52 = vclamps-f32 %v651_v50, 0.01 }
 0x1e7   : > { %v655_v53 = vpop.f32.mrf.mxu1 }
 0x1e8   : > { %v713_v54 = vsub.f32 %v651_v50, %v849_v52  ;;  %v656_v55 = vadd.f32 %v1161_v38, %v655_v53 }
 0x1e9   : > { %v966_v56 = vpop.f32.mrf.mxu1 }
 0x1ea   : > { %731 = vst.msk [vmem:[%s1168_s25 + $0x78] sm:$0xff] %vm331_vm1, %v713_v54  ;;  %v850_v57 = vclamps-f32 %v656_v55, 0.01 }
 0x1eb   : > { %v658_v58 = vpop.f32.mrf.mxu1 }
 0x1ec   : > { %v714_v59 = vsub.f32 %v656_v55, %v850_v57  ;;  %v659_v60 = vadd.f32 %v1161_v38, %v658_v58 }
 0x1ed   : > { %v967_v61 = vpop.f32.mrf.mxu1 }
 0x1ee   : > { %732 = vst.msk [vmem:[%s1168_s25 + $0x80] sm:$0xff] %vm331_vm1, %v714_v59  ;;  %v851_v62 = vclamps-f32 %v659_v60, 0.01 }
 0x1f0   : > { %v715_v63 = vsub.f32 %v659_v60, %v851_v62 }
 0x1f2   : > { %733 = vst.msk [vmem:[%s1168_s25 + $0x88] sm:$0xff] %vm331_vm1, %v715_v63 }
 0x1f3 PF: > { %s15_s18 = sadd.s32 1, %s1001_s18  }
 0x1f4   : > { %p12_p4 = scmp.ge.s32.totalorder %s15_s18, 4  }
 0x1f6   :  { %14 = sbr.rel (!%p12_p4) target bundleno = 1 (0x1), region = 70 }

</bundles_post_ra>
